<compile_context>
chip_gen: v5e
topology: v5e:2x2
jax: 0.10.0
libtpu: 0.0.40
codegen_flags: <defaults>
</compile_context>

<pallas_src>
import jax
import jax.numpy as jnp
from jax.experimental import pallas as pl
from jax.experimental.pallas import tpu as pltpu


def _round_up(x, m):
    return ((x + m - 1) // m) * m


def hybrid_kernel(feat_ref, emb_ref, wf_ref, we_ref, bc_ref, w3t_ref, b3_ref,
                  out_ref):
    # Fused Linear(96 -> 32) split into two input streams (no concat in HBM),
    # accumulated in f32 on the MXU, then ReLU.
    h2 = (jnp.dot(feat_ref[...], wf_ref[...], preferred_element_type=jnp.float32)
          + jnp.dot(emb_ref[...], we_ref[...], preferred_element_type=jnp.float32)
          + bc_ref[...])
    h2 = jnp.maximum(h2, 0.0)

    # combined_mlp[2]: Linear(32 -> 1), computed transposed so the output is
    # lane-dense:  (1,32) . (tile,32)^T -> (1, tile).  b3 comes from SMEM.
    out_t = jax.lax.dot_general(
        w3t_ref[...], h2,
        dimension_numbers=(((1,), (1,)), ((), ())),
        preferred_element_type=jnp.float32) + b3_ref[0, 0]
    out_ref[...] = out_t.reshape(out_ref.shape)


def _pick_tile(batch, tile_b, split_threshold=2048):
    # Rows per grid step; must be a multiple of 8 (sublane granularity).
    tile = min(tile_b, _round_up(batch, 8))
    # If the whole batch fits in one step, split 2-way only when each half is
    # still large (>= split_threshold rows): amortizes the ~0.35us per-step
    # overhead while letting both v7x TensorCores participate; avoids
    # gratuitous extra steps on single-TC v5e / v6e.
    if tile >= batch and batch >= 2 * split_threshold:
        tile = _round_up(pl.cdiv(batch, 2), 8)
    return max(8, min(tile, _round_up(batch, 8)))


def hybrid_forward(user_ids, user_features, params, *, tile_b=4096,
                   activation_dtype=jnp.bfloat16):
    """Pallas implementation of HybridModel.forward."""
    w1, b1, emb_table, w2, b2, w3, b3 = (
        params["w1"], params["b1"], params["emb"],
        params["w2"], params["b2"], params["w3"], params["b3"],
    )
    B, F = user_features.shape
    H = w1.shape[1]  # 32

    # ---- XLA glue: gather + constant folding (no concat, no pad) ----
    id_repr = jnp.take(emb_table, user_ids, axis=0)          # (B, 32)
    feat = user_features.astype(activation_dtype)            # (B, 64)
    emb = id_repr.astype(activation_dtype)                    # (B, 32)

    w2a, w2b = w2[:H], w2[H:]                                  # (32,32), (32,32)
    w_feat = (w1 @ w2a).astype(activation_dtype)               # (64, 32)
    w_emb = w2b.astype(activation_dtype)                       # (32, 32)
    b_comb = (b1 @ w2a + b2).astype(jnp.float32)               # (1, 32)
    w3t = w3.T.astype(jnp.float32)                             # (1, 32)
    b3 = b3.astype(jnp.float32)                                # (1, 1)

    # ---- tiling: grid covers B with a possibly-partial last block ----
    tile = _pick_tile(B, tile_b)
    num_tiles = pl.cdiv(B, tile)
    b_pad = num_tiles * tile

    out3 = pl.pallas_call(
        hybrid_kernel,
        out_shape=jax.ShapeDtypeStruct((num_tiles, 1, tile), jnp.float32),
        grid_spec=pltpu.PrefetchScalarGridSpec(
            num_scalar_prefetch=0,
            grid=(num_tiles,),
            in_specs=[
                pl.BlockSpec((tile, F), lambda i: (i, 0)),   # features tile
                pl.BlockSpec((tile, H), lambda i: (i, 0)),   # embedding tile
                pl.BlockSpec((F, H), lambda i: (0, 0)),      # w_feat (64,32)
                pl.BlockSpec((H, H), lambda i: (0, 0)),      # w_emb  (32,32)
                pl.BlockSpec((1, H), lambda i: (0, 0)),      # fused bias (1,32)
                pl.BlockSpec((1, H), lambda i: (0, 0)),      # W3^T   (1,32)
                pl.BlockSpec(memory_space=pltpu.MemorySpace.SMEM),  # b3 scalar
            ],
            out_specs=pl.BlockSpec((1, 1, tile), lambda i: (i, 0, 0)),
        ),
        compiler_params=pltpu.CompilerParams(
            dimension_semantics=("parallel",)),
    )(feat, emb, w_feat, w_emb, b_comb, w3t, b3)

    # (num_tiles, 1, tile) -> (B, 1); rows >= B came from OOB input reads and
    # are discarded here (never reduced over or reused).
    return out3.reshape(b_pad, 1)[:B]


def hybrid_reference(user_ids, user_features, params):
    """Pure-JAX reference for correctness checking."""
    h1 = user_features @ params["w1"] + params["b1"]
    emb = jnp.take(params["emb"], user_ids, axis=0)
    combined = jnp.concatenate([h1, emb], axis=1)
    h2 = jnp.maximum(combined @ params["w2"] + params["b2"], 0.0)
    return h2 @ params["w3"] + params["b3"]


def init_params(key, n_users, user_feature_dim, hidden=32):
    ks = jax.random.split(key, 7)
    # Deterministic synthetic init (PyTorch-like scale); not a checkpoint load.
    def lin(kw, fan_in, fan_out):
        bound = 1.0 / jnp.sqrt(fan_in)
        return jax.random.uniform(kw, (fan_in, fan_out), jnp.float32, -bound, bound)
    return {
        "w1": lin(ks[0], user_feature_dim, hidden),
        "b1": jax.random.uniform(ks[1], (1, hidden), jnp.float32,
                                 -1.0 / jnp.sqrt(user_feature_dim),
                                 1.0 / jnp.sqrt(user_feature_dim)),
        "emb": jax.random.normal(ks[2], (n_users, hidden), jnp.float32),
        "w2": lin(ks[3], 2 * hidden, hidden),
        "b2": jax.random.uniform(ks[4], (1, hidden), jnp.float32,
                                 -1.0 / jnp.sqrt(2 * hidden),
                                 1.0 / jnp.sqrt(2 * hidden)),
        "w3": lin(ks[5], hidden, 1),
        "b3": jax.random.uniform(ks[6], (1, 1), jnp.float32,
                                 -1.0 / jnp.sqrt(hidden),
                                 1.0 / jnp.sqrt(hidden)),
    }


if __name__ == "__main__":
    n_users = 1000
    user_feature_dim = 64

    key = jax.random.PRNGKey(0)
    k_params, k_ids, k_feat = jax.random.split(key, 3)
    params = init_params(k_params, n_users, user_feature_dim)

    user_ids = None
    user_features = None
    ref = None
    # Two small batch sizes: one tiny, one not a multiple of 8 (exercises the
    # partial-last-block path with no input padding).
    for batch in (8, 37):
        kb = jax.random.fold_in(k_ids, batch)
        kf = jax.random.fold_in(k_feat, batch)
        user_ids = jax.random.randint(kb, (batch,), 0, n_users, dtype=jnp.int32)
        user_features = jax.random.normal(kf, (batch, user_feature_dim),
                                          jnp.float32)
        ref = hybrid_reference(user_ids, user_features, params)

        out = jax.block_until_ready(
            hybrid_forward(user_ids, user_features, params,
                           activation_dtype=jnp.float32))
        assert out.shape == (batch, 1)
        assert jnp.allclose(out, ref, atol=1e-4, rtol=1e-4), (batch, out, ref)

    # Default bf16-activation path (halves streamed HBM traffic); looser
    # tolerance for the bf16 rounding of the streamed inputs.
    out_bf16 = jax.block_until_ready(
        hybrid_forward(user_ids, user_features, params))
    assert out_bf16.shape == ref.shape
    assert jnp.allclose(out_bf16, ref, atol=5e-2, rtol=5e-2)

    print("KERNEL_OK")
</pallas_src>

<mosaic_0001>
module attributes {stable_mosaic.version = 11 : i64} {
  func.func @hybrid_kernel(%arg0: i32, %arg1: memref<8x64xf32, #tpu.memory_space<vmem>>, %arg2: memref<8x32xf32, #tpu.memory_space<vmem>>, %arg3: memref<64x32xf32, #tpu.memory_space<vmem>>, %arg4: memref<32x32xf32, #tpu.memory_space<vmem>>, %arg5: memref<1x32xf32, #tpu.memory_space<vmem>>, %arg6: memref<1x32xf32, #tpu.memory_space<vmem>>, %arg7: memref<1x1xf32, #tpu.memory_space<smem>>, %arg8: memref<1x1x8xf32, #tpu.memory_space<vmem>>) attributes {dimension_semantics = [#tpu.dimension_semantics<parallel>], iteration_bounds = array<i64: 1>, scalar_prefetch = 0 : i64, scratch_operands = 0 : i64, tpu.core_type = #tpu.core_type<tc>, window_params = [{transform_indices = @transform_0, window_bounds = array<i64: 8, 64>}, {transform_indices = @transform_1, window_bounds = array<i64: 8, 32>}, {pipeline_mode = #tpu.pipeline_mode<synchronous>, transform_indices = @transform_2, window_bounds = array<i64: 64, 32>}, {pipeline_mode = #tpu.pipeline_mode<synchronous>, transform_indices = @transform_3, window_bounds = array<i64: 32, 32>}, {pipeline_mode = #tpu.pipeline_mode<synchronous>, transform_indices = @transform_4, window_bounds = array<i64: 1, 32>}, {pipeline_mode = #tpu.pipeline_mode<synchronous>, transform_indices = @transform_5, window_bounds = array<i64: 1, 32>}, {transform_indices = @transform_6, window_bounds = array<i64: 1, 1>}, {transform_indices = @transform_7, window_bounds = array<i64: 1, 1, 8>}]} {
    %c0 = arith.constant 0 : index
    %c0_0 = arith.constant 0 : index
    %0 = vector.load %arg1[%c0, %c0_0] : memref<8x64xf32, #tpu.memory_space<vmem>>, vector<8x64xf32>
    %c0_1 = arith.constant 0 : index
    %c0_2 = arith.constant 0 : index
    %1 = vector.load %arg3[%c0_1, %c0_2] : memref<64x32xf32, #tpu.memory_space<vmem>>, vector<64x32xf32>
    %cst = arith.constant dense<0.000000e+00> : vector<8x32xf32>
    %2 = tpu.matmul %0, %1, %cst {dimension_numbers = #tpu.dot_dimension_numbers<[1], [0], [0], [1], [0, 0, 1, 1], [], []>} : vector<8x64xf32>, vector<64x32xf32>, vector<8x32xf32> -> vector<8x32xf32>
    %c0_3 = arith.constant 0 : index
    %c0_4 = arith.constant 0 : index
    %3 = vector.load %arg2[%c0_3, %c0_4] : memref<8x32xf32, #tpu.memory_space<vmem>>, vector<8x32xf32>
    %c0_5 = arith.constant 0 : index
    %c0_6 = arith.constant 0 : index
    %4 = vector.load %arg4[%c0_5, %c0_6] : memref<32x32xf32, #tpu.memory_space<vmem>>, vector<32x32xf32>
    %cst_7 = arith.constant dense<0.000000e+00> : vector<8x32xf32>
    %5 = tpu.matmul %3, %4, %cst_7 {dimension_numbers = #tpu.dot_dimension_numbers<[1], [0], [0], [1], [0, 0, 1, 1], [], []>} : vector<8x32xf32>, vector<32x32xf32>, vector<8x32xf32> -> vector<8x32xf32>
    %6 = arith.addf %2, %5 : vector<8x32xf32>
    %c0_8 = arith.constant 0 : index
    %c0_9 = arith.constant 0 : index
    %7 = vector.load %arg5[%c0_8, %c0_9] : memref<1x32xf32, #tpu.memory_space<vmem>>, vector<1x32xf32>
    %8 = vector.broadcast %7 : vector<1x32xf32> to vector<8x32xf32>
    %9 = arith.addf %6, %8 : vector<8x32xf32>
    %cst_10 = arith.constant 0.000000e+00 : f32
    %10 = vector.broadcast %cst_10 : f32 to vector<8x32xf32>
    %11 = arith.maximumf %9, %10 : vector<8x32xf32>
    %c0_11 = arith.constant 0 : index
    %c0_12 = arith.constant 0 : index
    %12 = vector.load %arg6[%c0_11, %c0_12] : memref<1x32xf32, #tpu.memory_space<vmem>>, vector<1x32xf32>
    %cst_13 = arith.constant dense<0.000000e+00> : vector<1x8xf32>
    %13 = tpu.matmul %12, %11, %cst_13 {dimension_numbers = #tpu.dot_dimension_numbers<[1], [1], [0], [0], [0, 0, 1, 0], [], []>} : vector<1x32xf32>, vector<8x32xf32>, vector<1x8xf32> -> vector<1x8xf32>
    %c0_14 = arith.constant 0 : index
    %c0_15 = arith.constant 0 : index
    %14 = memref.load %arg7[%c0_14, %c0_15] : memref<1x1xf32, #tpu.memory_space<smem>>
    %15 = vector.broadcast %14 : f32 to vector<1x8xf32>
    %16 = arith.addf %13, %15 : vector<1x8xf32>
    %17 = vector.shape_cast %16 : vector<1x8xf32> to vector<1x1x8xf32>
    %c0_16 = arith.constant 0 : index
    %c0_17 = arith.constant 0 : index
    %c0_18 = arith.constant 0 : index
    %18 = vector.load %arg8[%c0_16, %c0_17, %c0_18] : memref<1x1x8xf32, #tpu.memory_space<vmem>>, vector<1x1x8xf32>
    tpu.vector_store %arg8[%c0_16, %c0_17, %c0_18], %17 {strides = array<i32>} : memref<1x1x8xf32, #tpu.memory_space<vmem>>, vector<1x1x8xf32>,
    return
  }
  func.func @transform_0(%arg0: i32) -> (i32, i32) {
    %c0_i32 = arith.constant 0 : i32
    %c0_i32_0 = arith.constant 0 : i32
    return %arg0, %c0_i32 : i32, i32
  }
  func.func @transform_1(%arg0: i32) -> (i32, i32) {
    %c0_i32 = arith.constant 0 : i32
    %c0_i32_0 = arith.constant 0 : i32
    return %arg0, %c0_i32 : i32, i32
  }
  func.func @transform_2(%arg0: i32) -> (i32, i32) {
    %c0_i32 = arith.constant 0 : i32
    %c0_i32_0 = arith.constant 0 : i32
    %c0_i32_1 = arith.constant 0 : i32
    return %c0_i32, %c0_i32_0 : i32, i32
  }
  func.func @transform_3(%arg0: i32) -> (i32, i32) {
    %c0_i32 = arith.constant 0 : i32
    %c0_i32_0 = arith.constant 0 : i32
    %c0_i32_1 = arith.constant 0 : i32
    return %c0_i32, %c0_i32_0 : i32, i32
  }
  func.func @transform_4(%arg0: i32) -> (i32, i32) {
    %c0_i32 = arith.constant 0 : i32
    %c0_i32_0 = arith.constant 0 : i32
    %c0_i32_1 = arith.constant 0 : i32
    return %c0_i32, %c0_i32_0 : i32, i32
  }
  func.func @transform_5(%arg0: i32) -> (i32, i32) {
    %c0_i32 = arith.constant 0 : i32
    %c0_i32_0 = arith.constant 0 : i32
    %c0_i32_1 = arith.constant 0 : i32
    return %c0_i32, %c0_i32_0 : i32, i32
  }
  func.func @transform_6(%arg0: i32) -> (i32, i32) {
    %c0_i32 = arith.constant 0 : i32
    %c0_i32_0 = arith.constant 0 : i32
    %c0_i32_1 = arith.constant 0 : i32
    return %c0_i32, %c0_i32_0 : i32, i32
  }
  func.func @transform_7(%arg0: i32) -> (i32, i32, i32) {
    %c0_i32 = arith.constant 0 : i32
    %c0_i32_0 = arith.constant 0 : i32
    %c0_i32_1 = arith.constant 0 : i32
    return %arg0, %c0_i32, %c0_i32_0 : i32, i32, i32
  }
}

</mosaic_0001>

<bundles_post_ra>
// kernel: tpu_custom_call.1
= control target key start
LH: loop header
LB: loop body
LE: loop exit
PB: predicated region body
PF: predicated region fallthrough
CT: control target
= control target key end

     0   :  { %s273_s0 = inlined_call_operand.vmem [shape: f32[8,64], index: 0, kind: input, shape index: {}]   ;;  %s274_s1 = inlined_call_operand.vmem [shape: f32[8,32], index: 1, kind: input, shape index: {}]   ;;  %s275_s2 = inlined_call_operand.vmem [shape: f32[64,32], index: 2, kind: input, shape index: {}]   ;;  %s276_s3 = inlined_call_operand.vmem [shape: f32[32,32], index: 3, kind: input, shape index: {}]   ;;  %s277_s4 = inlined_call_operand.vmem [shape: f32[1,32], index: 4, kind: input, shape index: {}]   ;;  %s278_s5 = inlined_call_operand.vmem [shape: f32[1,32], index: 5, kind: input, shape index: {}]   ;;  %s279_s6 = inlined_call_operand.<no memory space> [shape: f32[1,1], index: 6, kind: input, shape index: {}]   ;;  %s280_s7 = inlined_call_operand.hbm [shape: f32[1,1,8], index: 7, kind: output, shape index: {}]  }
   0x1   :  { %v36_v0 = vld [vmem:[%s275_s2 + $0x38] sm:$0xff]  ;;  %v35_v1 = vld [vmem:[%s275_s2 + $0x30] sm:$0xff]  ;;  %v34_v3 = vld [vmem:[%s275_s2 + $0x28] sm:$0xff] }
   0x2   :  { %78 = vmatpush.msra.mxu1 %v36_v0  ;;  %v41_v2 = vld [vmem:[%s276_s3 + $0x18] sm:$0xff]  ;;  %v40_v4 = vld [vmem:[%s276_s3 + $0x10] sm:$0xff]  ;;  %v39_v5 = vld [vmem:[%s276_s3 + $0x8] sm:$0xff] }
   0x3   :  { %58 = vmatpush.msra.mxu0 %v41_v2  ;;  %v33_v6 = vld [vmem:[%s275_s2 + $0x20] sm:$0xff] }
   0x4   :  { %79 = vmatpush.msra.mxu1 %v35_v1  ;;  %v38_v7 = vld [vmem:[%s276_s3] sm:$0xff] }
   0x5   :  { %59 = vmatpush.msra.mxu0 %v40_v4 }
   0x6   :  { %80 = vmatpush.msra.mxu1 %v34_v3 }
   0x7   :  { %13 = vsyncpa [#allocation4], 0  ;;  %v32_v8 = vld [vmem:[%s275_s2 + $0x18] sm:$0xff]  ;;  %60 = vmatpush.msra.mxu0 %v39_v5  ;;  %v37_v9 = vld [vmem:[%s274_s1] sm:$0xff]  ;;  %vm42_vm0 = vcmask 261120   ;;  %vm66_vm1 = vcmask 523264   ;;  %v98_v21 = vstv %s279_s6 }
   0x8   :  { %81 = vmatpush.msra.mxu1 %v33_v6  ;;  %v31_v10 = vld [vmem:[%s275_s2 + $0x10] sm:$0xff]  ;;  %v30_v11 = vld [vmem:[%s275_s2 + $0x8] sm:$0xff]  ;;  %v29_v12 = vld [vmem:[%s275_s2] sm:$0xff]  ;;  %s175_s8 = smov [#allocation3]   ;;  %s134_s11 = sshll.u32 %s280_s7, 4  ;;  %vm125_vm2 = vcmask 57344   ;;  %s135_s11 = int_to_ptr.hbm [resolvable:$true] %s134_s11 }
   0x9   :  { %61 = vmatpush.msra.mxu0 %v38_v7  ;;  %v28_v13 = vld [vmem:[%s273_s0] sm:$0xff]  ;;  %s132_s9 = sshll.u32 %s175_s8, 4  ;;  %s133_s9 = int_to_ptr.vmem [resolvable:$true] %s132_s9 }
   0xa   :  { %82 = vmatpush.msra.mxu1 %v32_v8  ;;  %143 = vmatmul.msk.f32.vlgmr.msra.gmra.mxu0 %vm42_vm0, %v37_v9  ;;  %v148_v15 = vld [vmem:[%s277_s4] ss:$0 sm:$0xff] }
   0xb   :  { %v96_v20 = vld [vmem:[%s278_s5] sm:$0x1] }
   0xc   :  { %83 = vmatpush.msra.mxu1 %v31_v10 }
   0xe   :  { %84 = vmatpush.msra.mxu1 %v30_v11 }
  0x10   :  { %85 = vmatpush.msra.mxu1 %v29_v12 }
  0x11   :  { %144 = vmatmul.msk.f32.vlgmr.msra.gmra.mxu1 %vm66_vm1, %v28_v13 }
  0x87   :  { %v63_v14 = vpop.f32.mrf.mxu0 }
  0x8e   :  { %v87_v16 = vpop.f32.mrf.mxu1 }
  0x8f   :  { %v88_v17 = vadd.f32 %v87_v16, %v63_v14 }
  0x91   :  { %v94_v18 = vadd.f32 %v148_v15, %v88_v17 }
  0x93   :  { %v95_v19 = vmax.f32 %v94_v18, 0.0 }
  0x95   :  { %145 = vmatpush.xpose.msk.msra.mxu2 %vm42_vm0, %v95_v19 }
  0x98   :  { %146 = vmatmul.msk.f32.vlgmr.msra.gmra.mxu2 %vm42_vm0, %v96_v20 }
 0x11b   :  { %v122_v22 = vpop.f32.mrf.mxu2 }
 0x11c   :  { %v123_v23 = vadd.f32 %v122_v22, %v98_v21 }
 0x11e   :  { %126 = vst.msk [vmem:[#allocation3] sm:$0x1] %vm125_vm2, %v123_v23 }
 0x11f   :  { %137 = dma.vmem_to_hbm [thread:$0]  %s133_s9, 16, %s135_s11, [#allocation4]  }
 0x120   :  { %173 = dma.done.wait [#allocation4], 16  }
 0x121   :  { %174 = vsyncadd [#allocation4], 4294967280 }
 0x122   :  { %142 = vsyncpa [#allocation4], 1 }

</bundles_post_ra>
